<compile_context>
chip_gen: v6e
topology: v6e:2x2x1
jax: 0.10.0
libtpu: 0.0.40
codegen_flags: <defaults>
</compile_context>

<pallas_src>
import jax
import jax.numpy as jnp
from jax.experimental import pallas as pl
from jax.experimental.pallas import tpu as pltpu
import numpy as np

EPS = 1e-5
VMEM_LIMIT = 32 * 1024 * 1024   # raise v5e's 16 MiB default; safe on v6e/v7x


def _choose_tile(L, max_tile=2048):
    """Largest multiple-of-128 divisor of L that is <= max_tile (else L)."""
    if L % 128 != 0:
        return L
    t = (min(max_tile, L) // 128) * 128
    while t > 128:
        if L % t == 0:
            return t
        t -= 128
    return 128


# ---------------------------------------------------------------------------
# Pass 1: channel moments of g and x (reduction pass for branch BatchNorms).
# ---------------------------------------------------------------------------
def _moments_kernel(g_ref, x_ref, sg_ref, gg_ref, sx_ref, gx_ref):
    @pl.when((pl.program_id(0) == 0) & (pl.program_id(1) == 0))
    def _():
        sg_ref[...] = jnp.zeros_like(sg_ref)
        gg_ref[...] = jnp.zeros_like(gg_ref)
        sx_ref[...] = jnp.zeros_like(sx_ref)
        gx_ref[...] = jnp.zeros_like(gx_ref)

    g = g_ref[0].astype(jnp.float32)          # (F_g, TL)  lanes = spatial
    x = x_ref[0].astype(jnp.float32)          # (F_l, TL)

    sg_ref[...] += jnp.sum(g, axis=1, keepdims=True)              # (F_g, 1)
    sx_ref[...] += jnp.sum(x, axis=1, keepdims=True)              # (F_l, 1)
    # Gram matrices (contract over the lane axis of both operands).
    gg_ref[...] += jax.lax.dot_general(
        g, g, (((1,), (1,)), ((), ())), preferred_element_type=jnp.float32)
    gx_ref[...] += jax.lax.dot_general(
        x, x, (((1,), (1,)), ((), ())), preferred_element_type=jnp.float32)


# ---------------------------------------------------------------------------
# Pass 2: BN-folded 1x1 convs + ReLU + psi pre-activation; psi moments.
# ---------------------------------------------------------------------------
def _psi_kernel(g_ref, x_ref, wg_ref, bg_ref, wx_ref, bx_ref, wp_ref, bp_ref,
                p_ref, ps_ref, pq_ref):
    @pl.when((pl.program_id(0) == 0) & (pl.program_id(1) == 0))
    def _():
        ps_ref[...] = jnp.zeros_like(ps_ref)
        pq_ref[...] = jnp.zeros_like(pq_ref)

    g = g_ref[0].astype(jnp.float32)          # (F_g, TL)
    x = x_ref[0].astype(jnp.float32)          # (F_l, TL)

    # BN is already folded into wg_eff/bg_eff, wx_eff/bx_eff.
    g1 = jnp.dot(wg_ref[...], g, preferred_element_type=jnp.float32) + bg_ref[...]
    x1 = jnp.dot(wx_ref[...], x, preferred_element_type=jnp.float32) + bx_ref[...]
    a = jnp.maximum(g1 + x1, 0.0)             # (F_int, TL)

    p = jnp.dot(wp_ref[...], a, preferred_element_type=jnp.float32) + bp_ref[...]
    p_ref[0] = p                              # lane-dense (1, TL) store
    ps_ref[...] += jnp.sum(p, axis=1, keepdims=True)
    pq_ref[...] += jnp.sum(p * p, axis=1, keepdims=True)


# ---------------------------------------------------------------------------
# Pass 3: gate.  out = x * sigmoid(p * s + t)   (psi BN folded to scalars).
# ---------------------------------------------------------------------------
def _gate_kernel(x_ref, p_ref, s_ref, t_ref, out_ref):
    p = p_ref[0]                                          # (1, TL)
    z = p * s_ref[...] + t_ref[...]                       # scalar broadcast
    psi = 1.0 / (1.0 + jnp.exp(-z))                       # exp on EUP
    x = x_ref[...].astype(jnp.float32)                    # (1, F_l, TL)
    out_ref[...] = (x * psi[:, None, :]).astype(out_ref.dtype)


# ---------------------------------------------------------------------------
# Wrapper.
# ---------------------------------------------------------------------------
def attention_block(g_nchw, x_nchw, params, *, max_tile=2048):
    """g: (N, F_g, H, W), x: (N, F_l, H, W) -> (N, F_l, H, W)."""
    N, F_g, H, W = g_nchw.shape
    _, F_l, _, _ = x_nchw.shape
    F_int = params["wg"].shape[0]
    L = H * W
    M = N * L
    TL = _choose_tile(L, max_tile)
    n_lt = L // TL

    # Pure reshapes — no transposes, no extra HBM traffic.
    g3 = g_nchw.reshape(N, F_g, L)
    x3 = x_nchw.reshape(N, F_l, L)

    cp_seq = pltpu.CompilerParams(
        dimension_semantics=("arbitrary", "arbitrary"),   # global accumulators
        vmem_limit_bytes=VMEM_LIMIT)
    cp_par = pltpu.CompilerParams(
        dimension_semantics=("parallel", "parallel"),     # megacore on v7x
        vmem_limit_bytes=VMEM_LIMIT)

    # ---- pass 1: moments --------------------------------------------------
    sum_g, gram_g, sum_x, gram_x = pl.pallas_call(
        _moments_kernel,
        grid=(N, n_lt),
        in_specs=[pl.BlockSpec((1, F_g, TL), lambda n, l: (n, 0, l)),
                  pl.BlockSpec((1, F_l, TL), lambda n, l: (n, 0, l))],
        out_specs=[pl.BlockSpec((F_g, 1), lambda n, l: (0, 0)),
                   pl.BlockSpec((F_g, F_g), lambda n, l: (0, 0)),
                   pl.BlockSpec((F_l, 1), lambda n, l: (0, 0)),
                   pl.BlockSpec((F_l, F_l), lambda n, l: (0, 0))],
        out_shape=[jax.ShapeDtypeStruct((F_g, 1), jnp.float32),
                   jax.ShapeDtypeStruct((F_g, F_g), jnp.float32),
                   jax.ShapeDtypeStruct((F_l, 1), jnp.float32),
                   jax.ShapeDtypeStruct((F_l, F_l), jnp.float32)],
        compiler_params=cp_seq,
    )(g3, x3)

    # ---- tiny JAX glue: analytic BN stats + fold into conv weights --------
    mean_g = sum_g[:, 0] / M
    cov_g = gram_g / M - jnp.outer(mean_g, mean_g)
    mean_x = sum_x[:, 0] / M
    cov_x = gram_x / M - jnp.outer(mean_x, mean_x)

    def fold(w, b, gam, bet, mean_in, cov_in):
        mu = w @ mean_in + b                              # (F_int,)
        var = jnp.sum((w @ cov_in) * w, axis=1)           # (F_int,)
        s = gam * jax.lax.rsqrt(var + EPS)
        return w * s[:, None], (b - mu) * s + bet

    wg_eff, bg_eff = fold(params["wg"], params["bg"],
                          params["gam_g"], params["bet_g"], mean_g, cov_g)
    wx_eff, bx_eff = fold(params["wx"], params["bx"],
                          params["gam_x"], params["bet_x"], mean_x, cov_x)

    # ---- pass 2: psi pre-activation + its moments -------------------------
    flops = 2 * M * (F_g + F_l) * F_int + 2 * M * F_int
    bytes_acc = 4 * M * (F_g + F_l + 1)
    p_raw, p_sum, p_sq = pl.pallas_call(
        _psi_kernel,
        grid=(N, n_lt),
        in_specs=[pl.BlockSpec((1, F_g, TL), lambda n, l: (n, 0, l)),
                  pl.BlockSpec((1, F_l, TL), lambda n, l: (n, 0, l)),
                  pl.BlockSpec((F_int, F_g), lambda n, l: (0, 0)),
                  pl.BlockSpec((F_int, 1), lambda n, l: (0, 0)),
                  pl.BlockSpec((F_int, F_l), lambda n, l: (0, 0)),
                  pl.BlockSpec((F_int, 1), lambda n, l: (0, 0)),
                  pl.BlockSpec((1, F_int), lambda n, l: (0, 0)),
                  pl.BlockSpec((1, 1), lambda n, l: (0, 0))],
        out_specs=[pl.BlockSpec((1, 1, TL), lambda n, l: (n, 0, l)),
                   pl.BlockSpec((1, 1), lambda n, l: (0, 0)),
                   pl.BlockSpec((1, 1), lambda n, l: (0, 0))],
        out_shape=[jax.ShapeDtypeStruct((N, 1, L), jnp.float32),
                   jax.ShapeDtypeStruct((1, 1), jnp.float32),
                   jax.ShapeDtypeStruct((1, 1), jnp.float32)],
        compiler_params=cp_seq,
        cost_estimate=pl.CostEstimate(flops=flops, transcendentals=0,
                                      bytes_accessed=bytes_acc),
    )(g3, x3, wg_eff, bg_eff[:, None], wx_eff, bx_eff[:, None],
      params["wp"], params["bp"].reshape(1, 1))

    # ---- tiny JAX glue: fold psi BatchNorm into two scalars ----------------
    mu_p = p_sum[0, 0] / M
    var_p = p_sq[0, 0] / M - mu_p * mu_p
    s_p = params["gam_p"][0] * jax.lax.rsqrt(var_p + EPS)
    t_p = params["bet_p"][0] - mu_p * s_p
    s_arr = jnp.reshape(s_p, (1, 1)).astype(jnp.float32)
    t_arr = jnp.reshape(t_p, (1, 1)).astype(jnp.float32)

    # ---- pass 3: sigmoid gate (fully parallel, lane-dense output) ----------
    out3 = pl.pallas_call(
        _gate_kernel,
        grid=(N, n_lt),
        in_specs=[pl.BlockSpec((1, F_l, TL), lambda n, l: (n, 0, l)),
                  pl.BlockSpec((1, 1, TL), lambda n, l: (n, 0, l)),
                  pl.BlockSpec((1, 1), lambda n, l: (0, 0)),
                  pl.BlockSpec((1, 1), lambda n, l: (0, 0))],
        out_specs=pl.BlockSpec((1, F_l, TL), lambda n, l: (n, 0, l)),
        out_shape=jax.ShapeDtypeStruct((N, F_l, L), x_nchw.dtype),
        compiler_params=cp_par,
    )(x3, p_raw, s_arr, t_arr)

    return out3.reshape(N, F_l, H, W)


# ---------------------------------------------------------------------------
# Pure-JAX reference (PyTorch train-mode semantics) and param init.
# ---------------------------------------------------------------------------
def _reference(g, x, params):
    def conv1x1(y, w, b):                                  # w: (Cout, Cin)
        return jnp.einsum('oc,nchw->nohw', w, y) + b[None, :, None, None]

    def bn(y, gam, bet):
        mu = jnp.mean(y, axis=(0, 2, 3), keepdims=True)
        var = jnp.mean((y - mu) ** 2, axis=(0, 2, 3), keepdims=True)
        return ((y - mu) / jnp.sqrt(var + EPS)) * gam[None, :, None, None] \
            + bet[None, :, None, None]

    g1 = bn(conv1x1(g, params["wg"], params["bg"]), params["gam_g"], params["bet_g"])
    x1 = bn(conv1x1(x, params["wx"], params["bx"]), params["gam_x"], params["bet_x"])
    a = jnp.maximum(g1 + x1, 0.0)
    p = bn(conv1x1(a, params["wp"], params["bp"]), params["gam_p"], params["bet_p"])
    return x * jax.nn.sigmoid(p)


def init_params(key, F_g, F_l, F_int):
    ks = jax.random.split(key, 6)
    return {
        # 1x1 conv weights stored (C_out, C_in); biases (C_out,).
        "wg": jax.random.normal(ks[0], (F_int, F_g), jnp.float32) * 0.5,
        "bg": jax.random.normal(ks[1], (F_int,), jnp.float32) * 0.1,
        "wx": jax.random.normal(ks[2], (F_int, F_l), jnp.float32) * 0.5,
        "bx": jax.random.normal(ks[3], (F_int,), jnp.float32) * 0.1,
        "wp": jax.random.normal(ks[4], (1, F_int), jnp.float32) * 0.5,
        "bp": jax.random.normal(ks[5], (1,), jnp.float32) * 0.1,
        # BatchNorm affine params (PyTorch init: weight=1, bias=0).
        "gam_g": jnp.ones((F_int,), jnp.float32),
        "bet_g": jnp.zeros((F_int,), jnp.float32),
        "gam_x": jnp.ones((F_int,), jnp.float32),
        "bet_x": jnp.zeros((F_int,), jnp.float32),
        "gam_p": jnp.ones((1,), jnp.float32),
        "bet_p": jnp.zeros((1,), jnp.float32),
    }


if __name__ == "__main__":
    key = jax.random.PRNGKey(0)
    k_g, k_x, k_p = jax.random.split(key, 3)

    N, F_g, F_l, F_int, H, W = 2, 4, 4, 8, 16, 16
    g = jax.random.normal(k_g, (N, F_g, H, W), jnp.float32)
    x = jax.random.normal(k_x, (N, F_l, H, W), jnp.float32)
    params = init_params(k_p, F_g, F_l, F_int)

    out = jax.jit(attention_block)(g, x, params)
    out = jax.block_until_ready(out)

    ref = jax.block_until_ready(_reference(g, x, params))
    np.testing.assert_allclose(np.asarray(out), np.asarray(ref),
                               rtol=1e-4, atol=1e-4)
    assert out.shape == (N, F_l, H, W)
    print("KERNEL_OK")
</pallas_src>

<mosaic_0001>
module attributes {stable_mosaic.version = 11 : i64} {
  func.func @_moments_kernel(%arg0: i32, %arg1: i32, %arg2: memref<1x4x256xf32, #tpu.memory_space<vmem>>, %arg3: memref<1x4x256xf32, #tpu.memory_space<vmem>>, %arg4: memref<4x1xf32, #tpu.memory_space<vmem>>, %arg5: memref<4x4xf32, #tpu.memory_space<vmem>>, %arg6: memref<4x1xf32, #tpu.memory_space<vmem>>, %arg7: memref<4x4xf32, #tpu.memory_space<vmem>>) attributes {dimension_semantics = [#tpu.dimension_semantics<arbitrary>, #tpu.dimension_semantics<arbitrary>], iteration_bounds = array<i64: 2, 1>, scalar_prefetch = 0 : i64, scratch_operands = 0 : i64, tpu.core_type = #tpu.core_type<tc>, window_params = [{transform_indices = @transform_0, window_bounds = array<i64: 1, 4, 256>}, {transform_indices = @transform_1, window_bounds = array<i64: 1, 4, 256>}, {pipeline_mode = #tpu.pipeline_mode<synchronous>, transform_indices = @transform_2, window_bounds = array<i64: 4, 1>}, {pipeline_mode = #tpu.pipeline_mode<synchronous>, transform_indices = @transform_3, window_bounds = array<i64: 4, 4>}, {pipeline_mode = #tpu.pipeline_mode<synchronous>, transform_indices = @transform_4, window_bounds = array<i64: 4, 1>}, {pipeline_mode = #tpu.pipeline_mode<synchronous>, transform_indices = @transform_5, window_bounds = array<i64: 4, 4>}]} {
    %c0_i32 = arith.constant 0 : i32
    %0 = arith.cmpi eq, %arg0, %c0_i32 : i32
    %c0_i32_0 = arith.constant 0 : i32
    %1 = arith.cmpi eq, %arg1, %c0_i32_0 : i32
    %2 = arith.andi %0, %1 : i1
    %3 = arith.extui %2 : i1 to i32
    %c0_i32_1 = arith.constant 0 : i32
    %4 = arith.cmpi ne, %3, %c0_i32_1 : i32
    scf.if %4 {
      %cst_26 = arith.constant 0.000000e+00 : f32
      %27 = vector.broadcast %cst_26 : f32 to vector<4x1xf32>
      %c0_27 = arith.constant 0 : index
      %c0_28 = arith.constant 0 : index
      %28 = vector.load %arg4[%c0_27, %c0_28] : memref<4x1xf32, #tpu.memory_space<vmem>>, vector<4x1xf32>
      tpu.vector_store %arg4[%c0_27, %c0_28], %27 {strides = array<i32>} : memref<4x1xf32, #tpu.memory_space<vmem>>, vector<4x1xf32>,
      %cst_29 = arith.constant 0.000000e+00 : f32
      %29 = vector.broadcast %cst_29 : f32 to vector<4x4xf32>
      %c0_30 = arith.constant 0 : index
      %c0_31 = arith.constant 0 : index
      %30 = vector.load %arg5[%c0_30, %c0_31] : memref<4x4xf32, #tpu.memory_space<vmem>>, vector<4x4xf32>
      tpu.vector_store %arg5[%c0_30, %c0_31], %29 {strides = array<i32>} : memref<4x4xf32, #tpu.memory_space<vmem>>, vector<4x4xf32>,
      %cst_32 = arith.constant 0.000000e+00 : f32
      %31 = vector.broadcast %cst_32 : f32 to vector<4x1xf32>
      %c0_33 = arith.constant 0 : index
      %c0_34 = arith.constant 0 : index
      %32 = vector.load %arg6[%c0_33, %c0_34] : memref<4x1xf32, #tpu.memory_space<vmem>>, vector<4x1xf32>
      tpu.vector_store %arg6[%c0_33, %c0_34], %31 {strides = array<i32>} : memref<4x1xf32, #tpu.memory_space<vmem>>, vector<4x1xf32>,
      %cst_35 = arith.constant 0.000000e+00 : f32
      %33 = vector.broadcast %cst_35 : f32 to vector<4x4xf32>
      %c0_36 = arith.constant 0 : index
      %c0_37 = arith.constant 0 : index
      %34 = vector.load %arg7[%c0_36, %c0_37] : memref<4x4xf32, #tpu.memory_space<vmem>>, vector<4x4xf32>
      tpu.vector_store %arg7[%c0_36, %c0_37], %33 {strides = array<i32>} : memref<4x4xf32, #tpu.memory_space<vmem>>, vector<4x4xf32>,
    } else {
    }
    %c0 = arith.constant 0 : index
    %c0_2 = arith.constant 0 : index
    %c0_3 = arith.constant 0 : index
    %5 = vector.load %arg2[%c0, %c0_2, %c0_3] : memref<1x4x256xf32, #tpu.memory_space<vmem>>, vector<1x4x256xf32>
    %6 = vector.shape_cast %5 : vector<1x4x256xf32> to vector<4x256xf32>
    %c0_4 = arith.constant 0 : index
    %c0_5 = arith.constant 0 : index
    %c0_6 = arith.constant 0 : index
    %7 = vector.load %arg3[%c0_4, %c0_5, %c0_6] : memref<1x4x256xf32, #tpu.memory_space<vmem>>, vector<1x4x256xf32>
    %8 = vector.shape_cast %7 : vector<1x4x256xf32> to vector<4x256xf32>
    %c0_7 = arith.constant 0 : index
    %c0_8 = arith.constant 0 : index
    %9 = vector.load %arg4[%c0_7, %c0_8] : memref<4x1xf32, #tpu.memory_space<vmem>>, vector<4x1xf32>
    %cst = arith.constant dense<0.000000e+00> : vector<4xf32>
    %10 = vector.multi_reduction <add>, %6, %cst [1] : vector<4x256xf32> to vector<4xf32>
    %11 = vector.shape_cast %10 : vector<4xf32> to vector<4x1xf32>
    %12 = arith.addf %9, %11 : vector<4x1xf32>
    %c0_9 = arith.constant 0 : index
    %c0_10 = arith.constant 0 : index
    %13 = vector.load %arg4[%c0_9, %c0_10] : memref<4x1xf32, #tpu.memory_space<vmem>>, vector<4x1xf32>
    tpu.vector_store %arg4[%c0_9, %c0_10], %12 {strides = array<i32>} : memref<4x1xf32, #tpu.memory_space<vmem>>, vector<4x1xf32>,
    %c0_11 = arith.constant 0 : index
    %c0_12 = arith.constant 0 : index
    %14 = vector.load %arg6[%c0_11, %c0_12] : memref<4x1xf32, #tpu.memory_space<vmem>>, vector<4x1xf32>
    %cst_13 = arith.constant dense<0.000000e+00> : vector<4xf32>
    %15 = vector.multi_reduction <add>, %8, %cst_13 [1] : vector<4x256xf32> to vector<4xf32>
    %16 = vector.shape_cast %15 : vector<4xf32> to vector<4x1xf32>
    %17 = arith.addf %14, %16 : vector<4x1xf32>
    %c0_14 = arith.constant 0 : index
    %c0_15 = arith.constant 0 : index
    %18 = vector.load %arg6[%c0_14, %c0_15] : memref<4x1xf32, #tpu.memory_space<vmem>>, vector<4x1xf32>
    tpu.vector_store %arg6[%c0_14, %c0_15], %17 {strides = array<i32>} : memref<4x1xf32, #tpu.memory_space<vmem>>, vector<4x1xf32>,
    %c0_16 = arith.constant 0 : index
    %c0_17 = arith.constant 0 : index
    %19 = vector.load %arg5[%c0_16, %c0_17] : memref<4x4xf32, #tpu.memory_space<vmem>>, vector<4x4xf32>
    %cst_18 = arith.constant dense<0.000000e+00> : vector<4x4xf32>
    %20 = tpu.matmul %6, %6, %cst_18 {dimension_numbers = #tpu.dot_dimension_numbers<[1], [1], [0], [0], [0, 0, 1, 0], [], []>} : vector<4x256xf32>, vector<4x256xf32>, vector<4x4xf32> -> vector<4x4xf32>
    %21 = arith.addf %19, %20 : vector<4x4xf32>
    %c0_19 = arith.constant 0 : index
    %c0_20 = arith.constant 0 : index
    %22 = vector.load %arg5[%c0_19, %c0_20] : memref<4x4xf32, #tpu.memory_space<vmem>>, vector<4x4xf32>
    tpu.vector_store %arg5[%c0_19, %c0_20], %21 {strides = array<i32>} : memref<4x4xf32, #tpu.memory_space<vmem>>, vector<4x4xf32>,
    %c0_21 = arith.constant 0 : index
    %c0_22 = arith.constant 0 : index
    %23 = vector.load %arg7[%c0_21, %c0_22] : memref<4x4xf32, #tpu.memory_space<vmem>>, vector<4x4xf32>
    %cst_23 = arith.constant dense<0.000000e+00> : vector<4x4xf32>
    %24 = tpu.matmul %8, %8, %cst_23 {dimension_numbers = #tpu.dot_dimension_numbers<[1], [1], [0], [0], [0, 0, 1, 0], [], []>} : vector<4x256xf32>, vector<4x256xf32>, vector<4x4xf32> -> vector<4x4xf32>
    %25 = arith.addf %23, %24 : vector<4x4xf32>
    %c0_24 = arith.constant 0 : index
    %c0_25 = arith.constant 0 : index
    %26 = vector.load %arg7[%c0_24, %c0_25] : memref<4x4xf32, #tpu.memory_space<vmem>>, vector<4x4xf32>
    tpu.vector_store %arg7[%c0_24, %c0_25], %25 {strides = array<i32>} : memref<4x4xf32, #tpu.memory_space<vmem>>, vector<4x4xf32>,
    return
  }
  func.func @transform_0(%arg0: i32, %arg1: i32) -> (i32, i32, i32) {
    %c0_i32 = arith.constant 0 : i32
    %c0_i32_0 = arith.constant 0 : i32
    return %arg0, %c0_i32, %arg1 : i32, i32, i32
  }
  func.func @transform_1(%arg0: i32, %arg1: i32) -> (i32, i32, i32) {
    %c0_i32 = arith.constant 0 : i32
    %c0_i32_0 = arith.constant 0 : i32
    return %arg0, %c0_i32, %arg1 : i32, i32, i32
  }
  func.func @transform_2(%arg0: i32, %arg1: i32) -> (i32, i32) {
    %c0_i32 = arith.constant 0 : i32
    %c0_i32_0 = arith.constant 0 : i32
    %c0_i32_1 = arith.constant 0 : i32
    return %c0_i32, %c0_i32_0 : i32, i32
  }
  func.func @transform_3(%arg0: i32, %arg1: i32) -> (i32, i32) {
    %c0_i32 = arith.constant 0 : i32
    %c0_i32_0 = arith.constant 0 : i32
    %c0_i32_1 = arith.constant 0 : i32
    return %c0_i32, %c0_i32_0 : i32, i32
  }
  func.func @transform_4(%arg0: i32, %arg1: i32) -> (i32, i32) {
    %c0_i32 = arith.constant 0 : i32
    %c0_i32_0 = arith.constant 0 : i32
    %c0_i32_1 = arith.constant 0 : i32
    return %c0_i32, %c0_i32_0 : i32, i32
  }
  func.func @transform_5(%arg0: i32, %arg1: i32) -> (i32, i32) {
    %c0_i32 = arith.constant 0 : i32
    %c0_i32_0 = arith.constant 0 : i32
    %c0_i32_1 = arith.constant 0 : i32
    return %c0_i32, %c0_i32_0 : i32, i32
  }
}

module attributes {stable_mosaic.version = 11 : i64} {
  func.func @_gate_kernel(%arg0: i32, %arg1: i32, %arg2: memref<1x4x256xf32, #tpu.memory_space<vmem>>, %arg3: memref<1x1x256xf32, #tpu.memory_space<vmem>>, %arg4: memref<1x1xf32, #tpu.memory_space<vmem>>, %arg5: memref<1x1xf32, #tpu.memory_space<vmem>>, %arg6: memref<1x4x256xf32, #tpu.memory_space<vmem>>) attributes {dimension_semantics = [#tpu.dimension_semantics<parallel>, #tpu.dimension_semantics<parallel>], iteration_bounds = array<i64: 2, 1>, scalar_prefetch = 0 : i64, scratch_operands = 0 : i64, tpu.core_type = #tpu.core_type<tc>, window_params = [{transform_indices = @transform_0, window_bounds = array<i64: 1, 4, 256>}, {transform_indices = @transform_1, window_bounds = array<i64: 1, 1, 256>}, {pipeline_mode = #tpu.pipeline_mode<synchronous>, transform_indices = @transform_2, window_bounds = array<i64: 1, 1>}, {pipeline_mode = #tpu.pipeline_mode<synchronous>, transform_indices = @transform_3, window_bounds = array<i64: 1, 1>}, {transform_indices = @transform_4, window_bounds = array<i64: 1, 4, 256>}]} {
    %c0 = arith.constant 0 : index
    %c0_0 = arith.constant 0 : index
    %c0_1 = arith.constant 0 : index
    %0 = vector.load %arg3[%c0, %c0_0, %c0_1] : memref<1x1x256xf32, #tpu.memory_space<vmem>>, vector<1x1x256xf32>
    %1 = vector.shape_cast %0 : vector<1x1x256xf32> to vector<1x256xf32>
    %c0_2 = arith.constant 0 : index
    %c0_3 = arith.constant 0 : index
    %2 = vector.load %arg4[%c0_2, %c0_3] : memref<1x1xf32, #tpu.memory_space<vmem>>, vector<1x1xf32>
    %3 = vector.broadcast %2 : vector<1x1xf32> to vector<1x256xf32>
    %4 = arith.mulf %1, %3 : vector<1x256xf32>
    %c0_4 = arith.constant 0 : index
    %c0_5 = arith.constant 0 : index
    %5 = vector.load %arg5[%c0_4, %c0_5] : memref<1x1xf32, #tpu.memory_space<vmem>>, vector<1x1xf32>
    %6 = vector.broadcast %5 : vector<1x1xf32> to vector<1x256xf32>
    %7 = arith.addf %4, %6 : vector<1x256xf32>
    %cst = arith.constant 0.000000e+00 : f32
    %8 = vector.broadcast %cst : f32 to vector<1x256xf32>
    %9 = arith.subf %8, %7 : vector<1x256xf32>
    %10 = math.exp %9 : vector<1x256xf32>
    %cst_6 = arith.constant 1.000000e+00 : f32
    %11 = vector.broadcast %cst_6 : f32 to vector<1x256xf32>
    %12 = arith.addf %11, %10 : vector<1x256xf32>
    %cst_7 = arith.constant 1.000000e+00 : f32
    %13 = vector.broadcast %cst_7 : f32 to vector<1x256xf32>
    %14 = arith.divf %13, %12 : vector<1x256xf32>
    %c0_8 = arith.constant 0 : index
    %c0_9 = arith.constant 0 : index
    %c0_10 = arith.constant 0 : index
    %15 = vector.load %arg2[%c0_8, %c0_9, %c0_10] : memref<1x4x256xf32, #tpu.memory_space<vmem>>, vector<1x4x256xf32>
    %16 = vector.shape_cast %14 : vector<1x256xf32> to vector<1x1x256xf32>
    %17 = vector.broadcast %16 : vector<1x1x256xf32> to vector<1x4x256xf32>
    %18 = arith.mulf %15, %17 : vector<1x4x256xf32>
    %c0_11 = arith.constant 0 : index
    %c0_12 = arith.constant 0 : index
    %c0_13 = arith.constant 0 : index
    %19 = vector.load %arg6[%c0_11, %c0_12, %c0_13] : memref<1x4x256xf32, #tpu.memory_space<vmem>>, vector<1x4x256xf32>
    tpu.vector_store %arg6[%c0_11, %c0_12, %c0_13], %18 {strides = array<i32>} : memref<1x4x256xf32, #tpu.memory_space<vmem>>, vector<1x4x256xf32>,
    return
  }
  func.func @transform_0(%arg0: i32, %arg1: i32) -> (i32, i32, i32) {
    %c0_i32 = arith.constant 0 : i32
    %c0_i32_0 = arith.constant 0 : i32
    return %arg0, %c0_i32, %arg1 : i32, i32, i32
  }
  func.func @transform_1(%arg0: i32, %arg1: i32) -> (i32, i32, i32) {
    %c0_i32 = arith.constant 0 : i32
    %c0_i32_0 = arith.constant 0 : i32
    return %arg0, %c0_i32, %arg1 : i32, i32, i32
  }
  func.func @transform_2(%arg0: i32, %arg1: i32) -> (i32, i32) {
    %c0_i32 = arith.constant 0 : i32
    %c0_i32_0 = arith.constant 0 : i32
    %c0_i32_1 = arith.constant 0 : i32
    return %c0_i32, %c0_i32_0 : i32, i32
  }
  func.func @transform_3(%arg0: i32, %arg1: i32) -> (i32, i32) {
    %c0_i32 = arith.constant 0 : i32
    %c0_i32_0 = arith.constant 0 : i32
    %c0_i32_1 = arith.constant 0 : i32
    return %c0_i32, %c0_i32_0 : i32, i32
  }
  func.func @transform_4(%arg0: i32, %arg1: i32) -> (i32, i32, i32) {
    %c0_i32 = arith.constant 0 : i32
    %c0_i32_0 = arith.constant 0 : i32
    return %arg0, %c0_i32, %arg1 : i32, i32, i32
  }
}

module attributes {stable_mosaic.version = 11 : i64} {
  func.func @_psi_kernel(%arg0: i32, %arg1: i32, %arg2: memref<1x4x256xf32, #tpu.memory_space<vmem>>, %arg3: memref<1x4x256xf32, #tpu.memory_space<vmem>>, %arg4: memref<8x4xf32, #tpu.memory_space<vmem>>, %arg5: memref<8x1xf32, #tpu.memory_space<vmem>>, %arg6: memref<8x4xf32, #tpu.memory_space<vmem>>, %arg7: memref<8x1xf32, #tpu.memory_space<vmem>>, %arg8: memref<1x8xf32, #tpu.memory_space<vmem>>, %arg9: memref<1x1xf32, #tpu.memory_space<vmem>>, %arg10: memref<1x1x256xf32, #tpu.memory_space<vmem>>, %arg11: memref<1x1xf32, #tpu.memory_space<vmem>>, %arg12: memref<1x1xf32, #tpu.memory_space<vmem>>) attributes {dimension_semantics = [#tpu.dimension_semantics<arbitrary>, #tpu.dimension_semantics<arbitrary>], iteration_bounds = array<i64: 2, 1>, scalar_prefetch = 0 : i64, scratch_operands = 0 : i64, tpu.core_type = #tpu.core_type<tc>, window_params = [{transform_indices = @transform_0, window_bounds = array<i64: 1, 4, 256>}, {transform_indices = @transform_1, window_bounds = array<i64: 1, 4, 256>}, {pipeline_mode = #tpu.pipeline_mode<synchronous>, transform_indices = @transform_2, window_bounds = array<i64: 8, 4>}, {pipeline_mode = #tpu.pipeline_mode<synchronous>, transform_indices = @transform_3, window_bounds = array<i64: 8, 1>}, {pipeline_mode = #tpu.pipeline_mode<synchronous>, transform_indices = @transform_4, window_bounds = array<i64: 8, 4>}, {pipeline_mode = #tpu.pipeline_mode<synchronous>, transform_indices = @transform_5, window_bounds = array<i64: 8, 1>}, {pipeline_mode = #tpu.pipeline_mode<synchronous>, transform_indices = @transform_6, window_bounds = array<i64: 1, 8>}, {pipeline_mode = #tpu.pipeline_mode<synchronous>, transform_indices = @transform_7, window_bounds = array<i64: 1, 1>}, {transform_indices = @transform_8, window_bounds = array<i64: 1, 1, 256>}, {pipeline_mode = #tpu.pipeline_mode<synchronous>, transform_indices = @transform_9, window_bounds = array<i64: 1, 1>}, {pipeline_mode = #tpu.pipeline_mode<synchronous>, transform_indices = @transform_10, window_bounds = array<i64: 1, 1>}]} {
    %c0_i32 = arith.constant 0 : i32
    %0 = arith.cmpi eq, %arg0, %c0_i32 : i32
    %c0_i32_0 = arith.constant 0 : i32
    %1 = arith.cmpi eq, %arg1, %c0_i32_0 : i32
    %2 = arith.andi %0, %1 : i1
    %3 = arith.extui %2 : i1 to i32
    %c0_i32_1 = arith.constant 0 : i32
    %4 = arith.cmpi ne, %3, %c0_i32_1 : i32
    scf.if %4 {
      %cst_35 = arith.constant 0.000000e+00 : f32
      %41 = vector.broadcast %cst_35 : f32 to vector<1x1xf32>
      %c0_36 = arith.constant 0 : index
      %c0_37 = arith.constant 0 : index
      %42 = vector.load %arg11[%c0_36, %c0_37] : memref<1x1xf32, #tpu.memory_space<vmem>>, vector<1x1xf32>
      tpu.vector_store %arg11[%c0_36, %c0_37], %41 {strides = array<i32>} : memref<1x1xf32, #tpu.memory_space<vmem>>, vector<1x1xf32>,
      %cst_38 = arith.constant 0.000000e+00 : f32
      %43 = vector.broadcast %cst_38 : f32 to vector<1x1xf32>
      %c0_39 = arith.constant 0 : index
      %c0_40 = arith.constant 0 : index
      %44 = vector.load %arg12[%c0_39, %c0_40] : memref<1x1xf32, #tpu.memory_space<vmem>>, vector<1x1xf32>
      tpu.vector_store %arg12[%c0_39, %c0_40], %43 {strides = array<i32>} : memref<1x1xf32, #tpu.memory_space<vmem>>, vector<1x1xf32>,
    } else {
    }
    %c0 = arith.constant 0 : index
    %c0_2 = arith.constant 0 : index
    %c0_3 = arith.constant 0 : index
    %5 = vector.load %arg2[%c0, %c0_2, %c0_3] : memref<1x4x256xf32, #tpu.memory_space<vmem>>, vector<1x4x256xf32>
    %6 = vector.shape_cast %5 : vector<1x4x256xf32> to vector<4x256xf32>
    %c0_4 = arith.constant 0 : index
    %c0_5 = arith.constant 0 : index
    %c0_6 = arith.constant 0 : index
    %7 = vector.load %arg3[%c0_4, %c0_5, %c0_6] : memref<1x4x256xf32, #tpu.memory_space<vmem>>, vector<1x4x256xf32>
    %8 = vector.shape_cast %7 : vector<1x4x256xf32> to vector<4x256xf32>
    %c0_7 = arith.constant 0 : index
    %c0_8 = arith.constant 0 : index
    %9 = vector.load %arg4[%c0_7, %c0_8] : memref<8x4xf32, #tpu.memory_space<vmem>>, vector<8x4xf32>
    %cst = arith.constant dense<0.000000e+00> : vector<8x256xf32>
    %10 = tpu.matmul %9, %6, %cst {dimension_numbers = #tpu.dot_dimension_numbers<[1], [0], [0], [1], [0, 0, 1, 1], [], []>} : vector<8x4xf32>, vector<4x256xf32>, vector<8x256xf32> -> vector<8x256xf32>
    %c0_9 = arith.constant 0 : index
    %c0_10 = arith.constant 0 : index
    %11 = vector.load %arg5[%c0_9, %c0_10] : memref<8x1xf32, #tpu.memory_space<vmem>>, vector<8x1xf32>
    %12 = vector.broadcast %11 : vector<8x1xf32> to vector<8x256xf32>
    %13 = arith.addf %10, %12 : vector<8x256xf32>
    %c0_11 = arith.constant 0 : index
    %c0_12 = arith.constant 0 : index
    %14 = vector.load %arg6[%c0_11, %c0_12] : memref<8x4xf32, #tpu.memory_space<vmem>>, vector<8x4xf32>
    %cst_13 = arith.constant dense<0.000000e+00> : vector<8x256xf32>
    %15 = tpu.matmul %14, %8, %cst_13 {dimension_numbers = #tpu.dot_dimension_numbers<[1], [0], [0], [1], [0, 0, 1, 1], [], []>} : vector<8x4xf32>, vector<4x256xf32>, vector<8x256xf32> -> vector<8x256xf32>
    %c0_14 = arith.constant 0 : index
    %c0_15 = arith.constant 0 : index
    %16 = vector.load %arg7[%c0_14, %c0_15] : memref<8x1xf32, #tpu.memory_space<vmem>>, vector<8x1xf32>
    %17 = vector.broadcast %16 : vector<8x1xf32> to vector<8x256xf32>
    %18 = arith.addf %15, %17 : vector<8x256xf32>
    %19 = arith.addf %13, %18 : vector<8x256xf32>
    %cst_16 = arith.constant 0.000000e+00 : f32
    %20 = vector.broadcast %cst_16 : f32 to vector<8x256xf32>
    %21 = arith.maximumf %19, %20 : vector<8x256xf32>
    %c0_17 = arith.constant 0 : index
    %c0_18 = arith.constant 0 : index
    %22 = vector.load %arg8[%c0_17, %c0_18] : memref<1x8xf32, #tpu.memory_space<vmem>>, vector<1x8xf32>
    %cst_19 = arith.constant dense<0.000000e+00> : vector<1x256xf32>
    %23 = tpu.matmul %22, %21, %cst_19 {dimension_numbers = #tpu.dot_dimension_numbers<[1], [0], [0], [1], [0, 0, 1, 1], [], []>} : vector<1x8xf32>, vector<8x256xf32>, vector<1x256xf32> -> vector<1x256xf32>
    %c0_20 = arith.constant 0 : index
    %c0_21 = arith.constant 0 : index
    %24 = vector.load %arg9[%c0_20, %c0_21] : memref<1x1xf32, #tpu.memory_space<vmem>>, vector<1x1xf32>
    %25 = vector.broadcast %24 : vector<1x1xf32> to vector<1x256xf32>
    %26 = arith.addf %23, %25 : vector<1x256xf32>
    %c0_22 = arith.constant 0 : index
    %c0_23 = arith.constant 0 : index
    %c0_24 = arith.constant 0 : index
    %27 = vector.load %arg10[%c0_22, %c0_23, %c0_24] : memref<1x1x256xf32, #tpu.memory_space<vmem>>, vector<1x1x256xf32>
    %28 = vector.shape_cast %27 : vector<1x1x256xf32> to vector<1x256xf32>
    %29 = vector.shape_cast %26 : vector<1x256xf32> to vector<1x1x256xf32>
    tpu.vector_store %arg10[%c0_22, %c0_23, %c0_24], %29 {strides = array<i32>} : memref<1x1x256xf32, #tpu.memory_space<vmem>>, vector<1x1x256xf32>,
    %c0_25 = arith.constant 0 : index
    %c0_26 = arith.constant 0 : index
    %30 = vector.load %arg11[%c0_25, %c0_26] : memref<1x1xf32, #tpu.memory_space<vmem>>, vector<1x1xf32>
    %cst_27 = arith.constant dense<0.000000e+00> : vector<1xf32>
    %31 = vector.multi_reduction <add>, %26, %cst_27 [1] : vector<1x256xf32> to vector<1xf32>
    %32 = vector.shape_cast %31 : vector<1xf32> to vector<1x1xf32>
    %33 = arith.addf %30, %32 : vector<1x1xf32>
    %c0_28 = arith.constant 0 : index
    %c0_29 = arith.constant 0 : index
    %34 = vector.load %arg11[%c0_28, %c0_29] : memref<1x1xf32, #tpu.memory_space<vmem>>, vector<1x1xf32>
    tpu.vector_store %arg11[%c0_28, %c0_29], %33 {strides = array<i32>} : memref<1x1xf32, #tpu.memory_space<vmem>>, vector<1x1xf32>,
    %c0_30 = arith.constant 0 : index
    %c0_31 = arith.constant 0 : index
    %35 = vector.load %arg12[%c0_30, %c0_31] : memref<1x1xf32, #tpu.memory_space<vmem>>, vector<1x1xf32>
    %36 = arith.mulf %26, %26 : vector<1x256xf32>
    %cst_32 = arith.constant dense<0.000000e+00> : vector<1xf32>
    %37 = vector.multi_reduction <add>, %36, %cst_32 [1] : vector<1x256xf32> to vector<1xf32>
    %38 = vector.shape_cast %37 : vector<1xf32> to vector<1x1xf32>
    %39 = arith.addf %35, %38 : vector<1x1xf32>
    %c0_33 = arith.constant 0 : index
    %c0_34 = arith.constant 0 : index
    %40 = vector.load %arg12[%c0_33, %c0_34] : memref<1x1xf32, #tpu.memory_space<vmem>>, vector<1x1xf32>
    tpu.vector_store %arg12[%c0_33, %c0_34], %39 {strides = array<i32>} : memref<1x1xf32, #tpu.memory_space<vmem>>, vector<1x1xf32>,
    return
  }
  func.func @transform_0(%arg0: i32, %arg1: i32) -> (i32, i32, i32) {
    %c0_i32 = arith.constant 0 : i32
    %c0_i32_0 = arith.constant 0 : i32
    return %arg0, %c0_i32, %arg1 : i32, i32, i32
  }
  func.func @transform_1(%arg0: i32, %arg1: i32) -> (i32, i32, i32) {
    %c0_i32 = arith.constant 0 : i32
    %c0_i32_0 = arith.constant 0 : i32
    return %arg0, %c0_i32, %arg1 : i32, i32, i32
  }
  func.func @transform_2(%arg0: i32, %arg1: i32) -> (i32, i32) {
    %c0_i32 = arith.constant 0 : i32
    %c0_i32_0 = arith.constant 0 : i32
    %c0_i32_1 = arith.constant 0 : i32
    return %c0_i32, %c0_i32_0 : i32, i32
  }
  func.func @transform_3(%arg0: i32, %arg1: i32) -> (i32, i32) {
    %c0_i32 = arith.constant 0 : i32
    %c0_i32_0 = arith.constant 0 : i32
    %c0_i32_1 = arith.constant 0 : i32
    return %c0_i32, %c0_i32_0 : i32, i32
  }
  func.func @transform_4(%arg0: i32, %arg1: i32) -> (i32, i32) {
    %c0_i32 = arith.constant 0 : i32
    %c0_i32_0 = arith.constant 0 : i32
    %c0_i32_1 = arith.constant 0 : i32
    return %c0_i32, %c0_i32_0 : i32, i32
  }
  func.func @transform_5(%arg0: i32, %arg1: i32) -> (i32, i32) {
    %c0_i32 = arith.constant 0 : i32
    %c0_i32_0 = arith.constant 0 : i32
    %c0_i32_1 = arith.constant 0 : i32
    return %c0_i32, %c0_i32_0 : i32, i32
  }
  func.func @transform_6(%arg0: i32, %arg1: i32) -> (i32, i32) {
    %c0_i32 = arith.constant 0 : i32
    %c0_i32_0 = arith.constant 0 : i32
    %c0_i32_1 = arith.constant 0 : i32
    return %c0_i32, %c0_i32_0 : i32, i32
  }
  func.func @transform_7(%arg0: i32, %arg1: i32) -> (i32, i32) {
    %c0_i32 = arith.constant 0 : i32
    %c0_i32_0 = arith.constant 0 : i32
    %c0_i32_1 = arith.constant 0 : i32
    return %c0_i32, %c0_i32_0 : i32, i32
  }
  func.func @transform_8(%arg0: i32, %arg1: i32) -> (i32, i32, i32) {
    %c0_i32 = arith.constant 0 : i32
    %c0_i32_0 = arith.constant 0 : i32
    return %arg0, %c0_i32, %arg1 : i32, i32, i32
  }
  func.func @transform_9(%arg0: i32, %arg1: i32) -> (i32, i32) {
    %c0_i32 = arith.constant 0 : i32
    %c0_i32_0 = arith.constant 0 : i32
    %c0_i32_1 = arith.constant 0 : i32
    return %c0_i32, %c0_i32_0 : i32, i32
  }
  func.func @transform_10(%arg0: i32, %arg1: i32) -> (i32, i32) {
    %c0_i32 = arith.constant 0 : i32
    %c0_i32_0 = arith.constant 0 : i32
    %c0_i32_1 = arith.constant 0 : i32
    return %c0_i32, %c0_i32_0 : i32, i32
  }
}

</mosaic_0001>

<bundles_post_ra>
// kernel: attention_block.3
= control target key start
LH: loop header
LB: loop body
LE: loop exit
PB: predicated region body
PF: predicated region fallthrough
CT: control target
= control target key end

     0   :  { %s625_s18 = smov 0   ;;  %s627_s19 = smov 0   ;;  %s694_s0 = inlined_call_operand.vmem [shape: f32[2,4,256], index: 0, kind: input, shape index: {}]   ;;  %s695_s1 = inlined_call_operand.vmem [shape: f32[2,4,256], index: 1, kind: input, shape index: {}]   ;;  %s696_s2 = inlined_call_operand.vmem [shape: f32[4,1], index: 2, kind: output, shape index: {0}]   ;;  %s697_s3 = inlined_call_operand.vmem [shape: f32[4,4], index: 3, kind: output, shape index: {1}]   ;;  %s698_s4 = inlined_call_operand.vmem [shape: f32[4,1], index: 4, kind: output, shape index: {2}]   ;;  %s699_s5 = inlined_call_operand.vmem [shape: f32[4,4], index: 5, kind: output, shape index: {3}]  }
   0x1   :  { %s629_s20 = smov 0  }
   0x2 LB: > { %s28_s21 = sadd.s32 1, %s588_s19  ;;  %p532_p0 = scmp.ge.s32.totalorder %s592_s20, 1  ;;  %s592_s20 = sphi %s629_s20, %s16_s20   ;;  %s588_s19 = sphi %s627_s19, %s701_s19   ;;  %s584_s18 = sphi %s625_s18, %s700_s18  }
   0x3   : > { %p30_p1 = scmp.ge.s32.totalorder %s28_s21, 2  ;;  %p210_p2 = scmp.lt.s32.totalorder %s592_s20, 3 }
   0x5   : > { %s703_s21 = smov (%p30_p1, %s28_s21), 0  ;;  %p211_p3 = pnand %p532_p0, %p210_p2 }
   0x6   : > { %p247_p4 = scmp.lt.s32.totalorder (!%p211_p3), %s584_s18, 1  ;;  %p266_p5 = scmp.eq.s32.totalorder (!%p211_p3), %s584_s18, 0 }
   0x7   : > { %214 = sbr.rel (%p211_p3) target bundleno = 221 (0xdd), region = 28 }
   0xc   : > { %s705_s18 = smov (!%p247_p4, %s584_s18), 1  ;;  %271 = sbr.rel (!%p266_p5) target bundleno = 17 (0x11), region = 32  ;;  %vm272_vm0 = vcmask (%p266_p5), 3072   ;;  %vm274_vm1 = vcmask (%p266_p5), 27648   ;;  %v594_v0 = vmov (%p266_p5), 0.0  }
   0xd   : > { %s540_s22 = sshll.u32 %s705_s18, 3  ;;  %273 = vst.msk [vmem:[%s696_s2] sm:$0xf] (%p266_p5), %vm272_vm0, %v594_v0  ;;  %276 = vst.msk [vmem:[%s698_s4] sm:$0xf] (%p266_p5), %vm272_vm0, %v594_v0 }
   0xe   : > { %s254_s25 = scalar_lea.vmem %s694_s0, %s540_s22  ;;  %s264_s28 = scalar_lea.vmem %s695_s1, %s540_s22  ;;  %275 = vst.msk [vmem:[%s697_s3] sm:$0xf] (%p266_p5), %vm274_vm1, %v594_v0  ;;  %277 = vst.msk [vmem:[%s699_s5] sm:$0xf] (%p266_p5), %vm274_vm1, %v594_v0 }
  0x11 PF: > { %v278_v1 = vld [vmem:[%s254_s25] sm:$0xff]  ;;  %vm284_vm2 = vcmask 1043456   ;;  %vm291_vm3 = vcmask 3072   ;;  %vm376_vm4 = vcmask 27648  }
  0x12   : > { %v279_v2 = vld [vmem:[%s264_s28] sm:$0xff]  ;;  %v282_v3 = vcombine.high %v278_v1, %v278_v1  ;;  %v285_v5 = vsel %vm284_vm2, %v278_v1, 0.0 }
  0x13   : > { %v295_v4 = vcombine.high %v279_v2, %v279_v2  ;;  %v297_v7 = vsel %vm284_vm2, %v279_v2, 0.0 }
  0x14   : > { %335 = vmatprep.subr.mxu0 %v282_v3  ;;  %v286_v6 = vsel %vm284_vm2, %v282_v3, 0.0  ;;  %369 = vmatprep.mubr.f32.mxu0 %v282_v3  ;;  %v280_v11 = vld [vmem:[%s696_s2] sm:$0xf] }
  0x15   : > { %409 = vmatprep.subr.mxu1 %v295_v4  ;;  %v298_v8 = vsel %vm284_vm2, %v295_v4, 0.0  ;;  %336 = vmatpush1.xpose.msra.mxu0 %v278_v1  ;;  %v287_v9 = vadd.f32 %v286_v6, %v285_v5  ;;  %v293_v14 = vld [vmem:[%s698_s4] sm:$0xf] }
  0x16   : > { %410 = vmatpush1.xpose.msra.mxu1 %v279_v2  ;;  %443 = vmatprep.mubr.f32.mxu1 %v295_v4  ;;  %v299_v10 = vadd.f32 %v298_v8, %v297_v7  ;;  %v304_v17 = vld [vmem:[%s697_s3] sm:$0xf] }
  0x17   : > { %288 = vadd.xlane.f32.xlu0 %v287_v9  ;;  %v378_v18 = vld [vmem:[%s699_s5] sm:$0xf] }
  0x18   : > { %370 = vmatmul.mubr.f32.vlgmr.msra.gmra.mxu0 %v278_v1 }
  0x19   : > { %444 = vmatmul.mubr.f32.vlgmr.msra.gmra.mxu1 %v279_v2 }
  0x1b   : > { %300 = vadd.xlane.f32.xlu0 %v299_v10 }
  0xa0   : > { %v289_v12 = vpop.xlane.xlu0 %288 }
  0xa1   : > { %v290_v13 = vadd.f32 %v289_v12, %v280_v11 }
  0xa3   : > { %292 = vst.msk [vmem:[%s696_s2] sm:$0xf] %vm291_vm3, %v290_v13 }
  0xa4   : > { %v301_v15 = vpop.xlane.xlu0 %300 }
  0xa5   : > { %v302_v16 = vadd.f32 %v301_v15, %v293_v14 }
  0xa7   : > { %303 = vst.msk [vmem:[%s698_s4] sm:$0xf] %vm291_vm3, %v302_v16 }
  0xd8   : > { %v371_v19 = vpop.f32.mrf.mxu0 }
  0xd9   : > { %v445_v20 = vpop.f32.mrf.mxu1  ;;  %v375_v21 = vadd.f32 %v371_v19, %v304_v17 }
  0xda   : > { %v449_v22 = vadd.f32 %v445_v20, %v378_v18  ;;  %v373_v23 = vpop.f32.mrf.mxu0 }
  0xdb   : > { %v447_v24 = vpop.f32.mrf.mxu1  ;;  %377 = vst.msk [vmem:[%s697_s3] sm:$0xf] %vm376_vm4, %v375_v21 }
  0xdc   : > { %450 = vst.msk [vmem:[%s699_s5] sm:$0xf] %vm376_vm4, %v449_v22 }
  0xdd PF: > { %s16_s20 = sadd.s32 1, %s592_s20   ;;  %s700_s18 = smov %s588_s19 }
  0xde   : > { %p13_p6 = scmp.ge.s32.totalorder %s16_s20, 4   ;;  %s701_s19 = smov %s703_s21 }
  0xe0   :  { %15 = sbr.rel (!%p13_p6) target bundleno = 2 (0x2), region = 85 }

// kernel: attention_block.5
= control target key start
LH: loop header
LB: loop body
LE: loop exit
PB: predicated region body
PF: predicated region fallthrough
CT: control target
= control target key end

     0   :  { %s519_s19 = smov 0   ;;  %s521_s20 = smov 0   ;;  %s555_s0 = inlined_call_operand.vmem [shape: f32[2,4,256], index: 0, kind: input, shape index: {}]   ;;  %s556_s1 = inlined_call_operand.vmem [shape: f32[2,1,256], index: 1, kind: input, shape index: {}]   ;;  %s557_s2 = inlined_call_operand.<no memory space> [shape: f32[1,1], index: 2, kind: input, shape index: {}]   ;;  %s558_s4 = inlined_call_operand.vmem [shape: f32[2,4,256], index: 4, kind: output, shape index: {}]   ;;  %s559_s3 = inlined_call_operand.<no memory space> [shape: f32[1,1], index: 3, kind: input, shape index: {}]  }
   0x1   :  { %v9_v0 = vstv %s557_s2  ;;  %v11_v1 = vstv %s559_s3  ;;  %s523_s21 = smov 0  }
   0x2   :  { %10 = vst [vmem:[#allocation2] sm:$0x1] %v9_v0  ;;  %12 = vst [vmem:[#allocation3] sm:$0x1] %v11_v1 }
   0x3 LB: > { %s30_s2 = sadd.s32 1, %s481_s20  ;;  %p423_p0 = scmp.ge.s32.totalorder %s485_s21, 1  ;;  %s485_s21 = sphi %s523_s21, %s18_s21   ;;  %s481_s20 = sphi %s521_s20, %s561_s20   ;;  %s477_s19 = sphi %s519_s19, %s560_s19  }
   0x4   : > { %p32_p1 = scmp.ge.s32.totalorder %s30_s2, 2  ;;  %p203_p2 = scmp.lt.s32.totalorder %s485_s21, 3 }
   0x6   : > { %s563_s2 = smov (%p32_p1, %s30_s2), 0  ;;  %p204_p3 = pnand %p423_p0, %p203_p2 }
   0x7   : > { %p246_p4 = scmp.lt.s32.totalorder (!%p204_p3), %s477_s19, 1 }
   0x8   : > { %207 = sbr.rel (%p204_p3) target bundleno = 188 (0xbc), region = 36 }
   0xd   : > { %v275_v2 = vld [vmem:[#allocation2] sm:$0x1]  ;;  %v487_v3 = vmov 0   ;;  %v286_v4 = vld [vmem:[#allocation3] sm:$0x1]  ;;  %v281_v5 = vlaneseq  ;;  %s565_s19 = smov (!%p246_p4, %s477_s19), 1 }
   0xe   : > { %458 = vset.pattern.permute.xlu0 %v487_v3  ;;  %s426_s3 = sshll.u32 %s565_s19, 1  ;;  %s431_s25 = sshll.u32 %s565_s19, 3 }
   0xf   : > { %278 = vperm.xlu0 %458, %v275_v2   ;;  %v282_v6 = vshrl.u32 %v281_v5, 7  ;;  %s262_s24 = scalar_lea.vmem %s556_s1, %s426_s3  ;;  %s253_s28 = scalar_lea.vmem %s555_s0, %s431_s25 }
  0x10   : > { %v274_v10 = vld [vmem:[%s262_s24] sm:$0x3]  ;;  %s272_s5 = scalar_lea.vmem %s558_s4, %s431_s25 }
  0x11   : > { %v283_v7 = vsub.s32 0, %v282_v6  ;;  %v311_v19 = vsub.s32 1, %v282_v6  ;;  %v303_v23 = vld [vmem:[%s253_s28] sm:$0xff] }
  0x13   : > { %289 = vperm.xlu0 %458, %v286_v4  }
  0x8a   : > { %v279_v8 = vpop.permute.xlu0 %278 }
  0x8b   : > { %v284_v9 = vrot.slane %v279_v8, %v283_v7 }
  0x8d   : > { %v285_v12 = vmul.f32 %v284_v9, %v274_v10 }
  0x8e   : > { %v290_v11 = vpop.permute.xlu0 %289 }
  0x8f   : > { %v295_v13 = vrot.slane %v290_v11, %v283_v7 }
  0x91   : > { %v296_v14 = vadd.f32 %v295_v13, %v285_v12 }
  0x93   : > { %v297_v15 = vsub.f32 0.0, %v296_v14 }
  0x95   : > { %v298_v16 = vmul.f32 1.442695, %v297_v15 }
  0x97   : > { %459 = vpow2.f32 %v298_v16 }
  0xa4   : > { %v460_v17 = vpop.eup %459 }
  0xa5   : > { %v300_v18 = vadd.f32 1.0, %v460_v17 }
  0xa7   : > { %461 = vrcp.f32 %v300_v18 }
  0xb4   : > { %v462_v20 = vpop.eup %461 }
  0xb5   : > { %v308_v21 = vrot.slane %v462_v20, %v283_v7  ;;  %v312_v22 = vrot.slane %v462_v20, %v311_v19 }
  0xb7   : > { %v313_v24 = vcombine.low %v308_v21, %v312_v22 }
  0xb9   : > { %v315_v25 = vmul.f32 %v313_v24, %v303_v23 }
  0xbb   : > { %316 = vst [vmem:[%s272_s5] sm:$0xff] %v315_v25 }
  0xbc PF: > { %s18_s21 = sadd.s32 1, %s485_s21   ;;  %s560_s19 = smov %s481_s20 }
  0xbd   : > { %p15_p5 = scmp.ge.s32.totalorder %s18_s21, 4   ;;  %s561_s20 = smov %s563_s2 }
  0xbf   :  { %17 = sbr.rel (!%p15_p5) target bundleno = 3 (0x3), region = 69 }

// kernel: attention_block.4
= control target key start
LH: loop header
LB: loop body
LE: loop exit
PB: predicated region body
PF: predicated region fallthrough
CT: control target
= control target key end

     0   :  { %s1203_s0 = inlined_call_operand.vmem [shape: f32[2,4,256], index: 0, kind: input, shape index: {}]   ;;  %s1204_s1 = inlined_call_operand.vmem [shape: f32[2,4,256], index: 1, kind: input, shape index: {}]   ;;  %s1205_s2 = inlined_call_operand.vmem [shape: f32[8,4], index: 2, kind: input, shape index: {}]   ;;  %s1206_s3 = inlined_call_operand.vmem [shape: f32[8,1], index: 3, kind: input, shape index: {}]   ;;  %s1207_s4 = inlined_call_operand.vmem [shape: f32[8,4], index: 4, kind: input, shape index: {}]   ;;  %s1208_s5 = inlined_call_operand.vmem [shape: f32[8,1], index: 5, kind: input, shape index: {}]   ;;  %s1209_s6 = inlined_call_operand.vmem [shape: f32[1,8], index: 6, kind: input, shape index: {}]   ;;  %s1210_s7 = inlined_call_operand.<no memory space> [shape: f32[1,1], index: 7, kind: input, shape index: {}]   ;;  %s1211_s8 = inlined_call_operand.vmem [shape: f32[2,1,256], index: 8, kind: output, shape index: {0}]   ;;  %s1212_s9 = inlined_call_operand.hbm [shape: f32[1,1], index: 9, kind: output, shape index: {1}]   ;;  %s1213_s10 = inlined_call_operand.hbm [shape: f32[1,1], index: 10, kind: output, shape index: {2}]  }
   0x1   :  { %v16_v0 = vstv %s1210_s7 }
   0x2   :  { %17 = vst [vmem:[#allocation2] sm:$0x1] %v16_v0 }
   0x3   :  { %18 = vsyncpa [#allocation4], 0 }
   0x4   :  { %19 = vsyncpa [#allocation6], 0  ;;  %s1114_s15 = smov 0   ;;  %s1116_s16 = smov 0  }
   0x5   :  { %s1118_s17 = smov 0  }
   0x6 LB: > { %s897_s7 = sadd.s32 4294967295, %s1048_s17   ;;  %s37_s18 = sadd.s32 1, %s1044_s16  ;;  %s1048_s17 = sphi %s1118_s17, %s25_s17   ;;  %s1044_s16 = sphi %s1116_s16, %s1216_s16   ;;  %s1040_s15 = sphi %s1114_s15, %s1215_s15  }
   0x7   : > { %p39_p0 = scmp.ge.s32.totalorder %s37_s18, 2  ;;  %p901_p1 = scmp.ge.s32.totalorder %s1048_s17, 1 }
   0x8   : > { %p349_p2 = scmp.lt.s32.totalorder %s1048_s17, 3 }
   0x9   : > { %s1218_s18 = smov (%p39_p0, %s37_s18), 0 }
   0xa   : > { %p350_p3 = pnand %p901_p1, %p349_p2 }
   0xb   : > { %p404_p4 = scmp.lt.s32.totalorder (!%p350_p3), %s1040_s15, 1  ;;  %p432_p5 = scmp.eq.s32.totalorder (!%p350_p3), %s1040_s15, 0 }
   0xc   : > { %353 = sbr.rel (%p350_p3) target bundleno = 589 (0x24d), region = 52 }
  0x11   : > { %s1220_s15 = smov (!%p404_p4, %s1040_s15), 1  ;;  %437 = sbr.rel (!%p432_p5) target bundleno = 22 (0x16), region = 56  ;;  %vm438_vm0 = vcmask (%p432_p5), 0   ;;  %v1050_v1 = vmov (%p432_p5), 0.0  }
  0x12   : > { %s921_s19 = sshll.u32 %s1220_s15, 3  ;;  %s906_s20 = sshll.u32 %s1220_s15, 1  ;;  %439 = vst.msk [vmem:[#allocation3] sm:$0x1] (%p432_p5), %vm438_vm0, %v1050_v1  ;;  %440 = vst.msk [vmem:[#allocation5] sm:$0x1] (%p432_p5), %vm438_vm0, %v1050_v1 }
  0x13   : > { %s411_s23 = scalar_lea.vmem %s1203_s0, %s921_s19  ;;  %s421_s26 = scalar_lea.vmem %s1204_s1, %s921_s19 }
  0x14   : > { %s1142_s29 = scalar_lea.vmem %s1211_s8, %s906_s20 }
  0x16 PF: > { %v441_v2 = vld [vmem:[%s411_s23] sm:$0xff]  ;;  %vm456_vm1 = vcmask 1043456   ;;  %v1051_v6 = vmov 0.0   ;;  %vm452_vm2 = vcmask 31744   ;;  %v1052_v9 = vmov 0   ;;  %s1054_s23 = smov [#allocation3]  }
  0x17   : > { %v442_v3 = vld [vmem:[%s421_s26] sm:$0xff]  ;;  %v451_v4 = vcombine.high %v441_v2, %v441_v2  ;;  %525 = vmatprep.mubr.f32.mxu0 %v1051_v6  ;;  %612 = vmatprep.mubr.f32.mxu1 %v1051_v6  ;;  %vm634_vm3 = vcmask 64512   ;;  %v630_v28 = vlaneseq  ;;  %v1053_v32 = vmov 1966171168   ;;  %s771_s24 = sshll.u32 %s1054_s23, 4  ;;  %p1166_p6 = scmp.eq.s32.totalorder %s897_s7, 1  ;;  %s772_s24 = int_to_ptr.vmem [resolvable:$true] %s771_s24 }
  0x18   : > { %v540_v5 = vcombine.high %v442_v3, %v442_v3  ;;  %v443_v7 = vld [vmem:[%s1205_s2] sm:$0xff]  ;;  %966 = vset.pattern.permute.xlu0 %v1052_v9  ;;  %967 = vset.pattern.permute.xlu1 %v1052_v9  ;;  %v713_v33 = vunpack.c.l.s4 %v1053_v32  ;;  %vm733_vm4 = vcmask 1040384   ;;  %vm740_vm6 = vcmask 0   ;;  %s1055_s26 = smov [#allocation5]   ;;  %s970_s28 = scalar_lea.vmem %s772_s24, 16 }
  0x19   : > { %v532_v8 = vld [vmem:[%s1207_s4] sm:$0xff]  ;;  %908 = vmatprep.subr.msk.mxu0 %vm456_vm1, %v451_v4  ;;  %v631_v29 = vshrl.u32 %v630_v28, 7  ;;  %vm729_vm5 = vcmp.lt.s32.totalorder %v630_v28, 256  ;;  %s782_s27 = sshll.u32 %s1055_s26, 4  ;;  %p971_p7 = scmp.ne.s32.totalorder %s772_s24, %s970_s28  ;;  %s783_s27 = int_to_ptr.vmem [resolvable:$true] %s782_s27 }
  0x1a   : > { %911 = vmatprep.subr.msk.mxu1 %vm456_vm1, %v540_v5  ;;  %v444_v10 = vld [vmem:[%s1206_s3] sm:$0xff]  ;;  %909 = vmatpush1.msk.msra.mxu0 %vm456_vm1, %v441_v2  ;;  %v714_v35 = vunpack.c.0.s8 %v713_v33  ;;  %p977_p10 = scmp.lt.s32.totalorder %s772_s24, %s772_s24 }
  0x1b   : > { %912 = vmatpush1.msk.msra.mxu1 %vm456_vm1, %v442_v3  ;;  %910 = vmatmul.mubr.msk.f32.vlgmr.msra.gmra.mxu0 %vm452_vm2, %v443_v7  ;;  %v533_v11 = vld [vmem:[%s1208_s5] sm:$0xff]  ;;  %v632_v30 = vsub.s32 0, %v631_v29  ;;  %p972_p8 = pnand %p971_p7, %p1166_p6 }
  0x1c   : > { %913 = vmatmul.mubr.msk.f32.vlgmr.msra.gmra.mxu1 %vm452_vm2, %v532_v8  ;;  %447 = vperm.xlu0 %966, %v444_v10   ;;  %v624_v12 = vld [vmem:[#allocation2] sm:$0x1]  ;;  %v717_v39 = vsub.s32 %v714_v35, %v631_v29  ;;  %v732_v52 = vld [vmem:[#allocation3] sm:$0x1]  ;;  %v742_v54 = vld [vmem:[#allocation5] sm:$0x1] }
  0x1d   : > { %702 = vmatprep.mubr.f32.mxu0 %v1051_v6  ;;  %627 = vperm.xlu1 %967, %v624_v12   ;;  %v623_v27 = vld [vmem:[%s1209_s6] sm:$0x1]  ;;  %p973_p9 = pneg %p972_p8 }
  0x20   : > { %536 = vperm.xlu0 %966, %v533_v11  }
  0x97   : > { %v448_v13 = vpop.permute.xlu0 %447 }
  0x98   : > { %v628_v31 = vpop.permute.xlu1 %627 }
  0x99   : > { %v633_v34 = vrot.slane %v628_v31, %v632_v30 }
  0x9b   : > { %v537_v14 = vpop.permute.xlu0 %536 }
  0xdb   : > { %v527_v15 = vpop.f32.mrf.mxu0 }
  0xdc   : > { %v614_v16 = vpop.f32.mrf.mxu1  ;;  %v528_v17 = vadd.f32 %v527_v15, %v448_v13 }
  0xdd   : > { %v615_v18 = vadd.f32 %v614_v16, %v537_v14  ;;  %v529_v19 = vpop.f32.mrf.mxu0 }
  0xde   : > { %v616_v20 = vpop.f32.mrf.mxu1  ;;  %v530_v21 = vadd.f32 %v529_v19, %v448_v13 }
  0xdf   : > { %v617_v22 = vadd.f32 %v616_v20, %v537_v14  ;;  %v619_v23 = vadd.f32 %v615_v18, %v528_v17 }
  0xe1   : > { %v620_v24 = vadd.f32 %v617_v22, %v530_v21  ;;  %v621_v26 = vmax.f32 %v619_v23, 0.0 }
  0xe3   : > { %v622_v25 = vmax.f32 %v620_v24, 0.0 }
  0xe5   : > { %668 = vmatprep.subr.mxu0 %v622_v25 }
  0xe6   : > { %669 = vmatpush1.msra.mxu0 %v621_v26 }
  0xe7   : > { %914 = vmatmul.mubr.msk.f32.vlgmr.msra.gmra.mxu0 %vm634_vm3, %v623_v27 }
 0x1a7   : > { %v704_v36 = vpop.f32.mrf.mxu0 }
 0x1a8   : > { %v705_v37 = vadd.f32 %v704_v36, %v633_v34 }
 0x1a9   : > { %v706_v38 = vpop.f32.mrf.mxu0 }
 0x1aa   : > { %v707_v40 = vadd.f32 %v706_v38, %v633_v34  ;;  %v743_v41 = vmul.f32 %v705_v37, %v705_v37  ;;  %v734_v43 = vsel %vm733_vm4, %v705_v37, 0.0 }
 0x1ac   : > { %v711_v42 = vcombine.low %v705_v37, %v707_v40  ;;  %v735_v44 = vsel %vm733_vm4, %v707_v40, 0.0  ;;  %v744_v45 = vmul.f32 %v707_v40, %v707_v40  ;;  %v745_v48 = vsel %vm733_vm4, %v743_v41, 0.0 }
 0x1ad   : > { %v736_v46 = vadd.f32 %v735_v44, %v734_v43 }
 0x1ae   : > { %v718_v47 = vrot.slane %v711_v42, %v717_v39  ;;  %v746_v49 = vsel %vm733_vm4, %v744_v45, 0.0 }
 0x1af   : > { %737 = vadd.xlane.f32.xlu1 %v736_v46  ;;  %v747_v50 = vadd.f32 %v746_v49, %v745_v48 }
 0x1b0   : > { %v725_v51 = vrot.slane %v718_v47, %v717_v39 }
 0x1b1   : > { %748 = vadd.xlane.f32.xlu0 %v747_v50 }
 0x1b2   : > { %731 = vst.msk [vmem:[%s1142_s29] sm:$0x3] %vm729_vm5, %v725_v51  ;;  %s976_s29 = scalar_lea.vmem %s772_s24, 32 }
 0x1b3   : > { %p978_p11 = scmp.lt.s32.totalorder %s976_s29, %s970_s28 }
 0x1b5   : > { %p979_p12 = por %p978_p11, %p977_p10 }
 0x1b7   : > { %p980_p13 = pnand %p979_p12, %p973_p9 }
 0x238   : > { %v738_v53 = vpop.xlane.xlu1 %737 }
 0x239   : > { %v739_v55 = vadd.f32 %v738_v53, %v732_v52 }
 0x23a   : > { %v749_v56 = vpop.xlane.xlu0 %748 }
 0x23b   : > { %v750_v57 = vadd.f32 %v749_v56, %v742_v54  ;;  %741 = vst.msk [vmem:[#allocation3] sm:$0x1] %vm740_vm6, %v739_v55 }
 0x23c   : > { %983 = shalt.err (!%p980_p13)
}
 0x23d   : > { %925 = dma.vmem_to_hbm [thread:$0]  (%p1166_p6), %s772_s24, 16, %s1212_s9, [#allocation4]   ;;  %751 = vst.msk [vmem:[#allocation5] sm:$0x1] %vm740_vm6, %v750_v57 }
 0x23e   : > { %s994_s11 = scalar_lea.vmem %s783_s27, 16  ;;  %s1000_s12 = scalar_lea.vmem %s783_s27, 32 }
 0x23f   : > { %p995_p0 = scmp.ne.s32.totalorder %s783_s27, %s994_s11  ;;  %p1001_p3 = scmp.lt.s32.totalorder %s783_s27, %s783_s27 }
 0x240   : > { %p1002_p4 = scmp.lt.s32.totalorder %s1000_s12, %s994_s11 }
 0x241   : > { %p996_p1 = pnand %p995_p0, %p1166_p6 }
 0x242   : > { %p1003_p5 = por %p1002_p4, %p1001_p3 }
 0x243   : > { %p997_p2 = pneg %p996_p1 }
 0x245   : > { %p1004_p7 = pnand %p1003_p5, %p997_p2 }
 0x247   : > { %1007 = shalt.err (!%p1004_p7)
}
 0x248   : > { %927 = dma.vmem_to_hbm [thread:$0]  (%p1166_p6), %s783_s27, 16, %s1213_s10, [#allocation6]  }
 0x249   : > { %1031 = dma.done.wait (%p1166_p6), [#allocation4], 16  }
 0x24a   : > { %1033 = vsyncadd (%p1166_p6), [#allocation4], 4294967280 }
 0x24b   : > { %1035 = dma.done.wait (%p1166_p6), [#allocation6], 16  }
 0x24c   : > { %1037 = vsyncadd (%p1166_p6), [#allocation6], 4294967280 }
 0x24d PF: > { %s25_s17 = sadd.s32 1, %s1048_s17   ;;  %s1215_s15 = smov %s1044_s16 }
 0x24e   : > { %p22_p8 = scmp.ge.s32.totalorder %s25_s17, 4   ;;  %s1216_s16 = smov %s1218_s18 }
 0x250   :  { %24 = sbr.rel (!%p22_p8) target bundleno = 6 (0x6), region = 106 }
 0x255   :  { %810 = vsyncpa [#allocation4], 1 }
 0x256   :  { %812 = vsyncpa [#allocation4 + $0x1], 1 }
 0x257   :  { %813 = vsyncpa [#allocation6], 1 }

</bundles_post_ra>
